<compile_context>
chip_gen: v5e
topology: v5e:2x2
jax: 0.10.0
libtpu: 0.0.40
codegen_flags: <defaults>
</compile_context>

<pallas_src>
import math
from functools import partial

import jax
import jax.numpy as jnp
from jax import lax
from jax.experimental import pallas as pl
from jax.experimental.pallas import tpu as pltpu


def _gelu_exact(x):
    # PyTorch nn.GELU() default: 0.5 * x * (1 + erf(x / sqrt(2)))
    return 0.5 * x * (1.0 + lax.erf(x * (1.0 / math.sqrt(2.0))))


def _gelu_tanh(x):
    # approximate='tanh' variant — exp/tanh run on the EUP slot (nearly free
    # under the MXU) but deviates slightly from PyTorch's default numerics.
    c = math.sqrt(2.0 / math.pi)
    return 0.5 * x * (1.0 + jnp.tanh(c * (x + 0.044715 * x * x * x)))


def _round_up(x, m):
    return ((x + m - 1) // m) * m


def mlp_kernel(x_ref, w1_ref, b1_ref, w2_ref, b2_ref, o_ref, *, approximate):
    # x_ref : [TM, Dp] (bf16)   w1_ref : [Dp, Hp] (bf16)   b1_ref : [1, Hp] (f32)
    # w2_ref: [Hp, Op] (bf16)   b2_ref : [1, Op] (f32)     o_ref  : [TM, Op]
    #
    # fc1 on the MXU: native bf16 operands, f32 accumulator.
    h = jnp.dot(x_ref[...], w1_ref[...], preferred_element_type=jnp.float32)
    h = h + b1_ref[...]                      # f32 bias add (VPU)

    # GELU epilogue in f32 (v5e has no bf16 VALU anyway).
    h = _gelu_tanh(h) if approximate else _gelu_exact(h)

    # drop1: p=0.0 -> identity

    # fc2 on the MXU: cast the f32 intermediate back to bf16 for full MXU rate.
    y = jnp.dot(h.astype(w2_ref.dtype), w2_ref[...],
                preferred_element_type=jnp.float32)
    y = y + b2_ref[...]                      # f32 bias add

    # drop2: p=0.0 -> identity
    o_ref[...] = y.astype(o_ref.dtype)


def mlp_forward(x, w1, b1, w2, b2, *, tile_m=None,
                compute_dtype=jnp.bfloat16, approximate_gelu=False):
    """x: [B, N, D]; w1: [D, H]; b1: [H]; w2: [H, O]; b2: [O] -> [B, N, O]."""
    B, N, D = x.shape
    H = w1.shape[1]
    O = w2.shape[1]
    M = B * N
    out_dtype = x.dtype

    # ---- Tile selection (M rows per grid step) -----------------------------
    if tile_m is None:
        tile_m = 256                         # MXU-friendly default (v6e/v7x)
    if M > 128:
        # Guarantee at least 2 grid steps for medium/large M so the pipeline
        # has something to overlap and v7x can use both TensorCores.
        tile_m = min(tile_m, _round_up((M + 1) // 2, 8))
    tile_m = max(8, min(_round_up(tile_m, 8), _round_up(M, 8)))
    Mp = _round_up(M, tile_m)

    # ---- Lane-dense padding of the feature dims (multiples of 128) ---------
    Dp = _round_up(D, 128)
    Hp = _round_up(H, 128)
    Op = _round_up(O, 128)

    def pad2(a, r, c):
        pr, pc = r - a.shape[0], c - a.shape[1]
        return jnp.pad(a, ((0, pr), (0, pc))) if (pr or pc) else a

    x2 = pad2(x.reshape(M, D), Mp, Dp).astype(compute_dtype)
    w1p = pad2(w1, Dp, Hp).astype(compute_dtype)
    w2p = pad2(w2, Hp, Op).astype(compute_dtype)
    b1p = pad2(b1.reshape(1, H).astype(jnp.float32), 1, Hp)
    b2p = pad2(b2.reshape(1, O).astype(jnp.float32), 1, Op)

    grid = (Mp // tile_m,)

    out = pl.pallas_call(
        partial(mlp_kernel, approximate=approximate_gelu),
        out_shape=jax.ShapeDtypeStruct((Mp, Op), out_dtype),
        grid_spec=pltpu.PrefetchScalarGridSpec(
            num_scalar_prefetch=0,
            grid=grid,
            in_specs=[
                pl.BlockSpec((tile_m, Dp), lambda i: (i, 0)),   # x tile (pipelined)
                pl.BlockSpec((Dp, Hp), lambda i: (0, 0)),       # W1 (resident, bf16)
                pl.BlockSpec((1, Hp), lambda i: (0, 0)),        # b1 (f32)
                pl.BlockSpec((Hp, Op), lambda i: (0, 0)),       # W2 (resident, bf16)
                pl.BlockSpec((1, Op), lambda i: (0, 0)),        # b2 (f32)
            ],
            out_specs=pl.BlockSpec((tile_m, Op), lambda i: (i, 0)),
        ),
        compiler_params=pltpu.CompilerParams(
            dimension_semantics=("parallel",),   # shard M-grid across TCs (v7x)
            vmem_limit_bytes=64 * 1024 * 1024,   # explicit budget (<= v7x physical)
        ),
    )(x2, w1p, b1p, w2p, b2p)

    return out[:M, :O].reshape(B, N, O)


def mlp_reference(x, w1, b1, w2, b2, compute_dtype=jnp.bfloat16):
    # Same numerics as the kernel: bf16 matmul operands, f32 accumulation,
    # exact-erf GELU, f32 bias adds.
    B, N, D = x.shape
    O = w2.shape[1]
    xc = x.reshape(B * N, D).astype(compute_dtype)
    h = jnp.dot(xc, w1.astype(compute_dtype),
                preferred_element_type=jnp.float32) + b1.astype(jnp.float32)
    h = _gelu_exact(h)
    y = jnp.dot(h.astype(compute_dtype), w2.astype(compute_dtype),
                preferred_element_type=jnp.float32) + b2.astype(jnp.float32)
    return y.reshape(B, N, O).astype(x.dtype)


if __name__ == "__main__":
    # Small ViT-ish shapes: batch=2, seq=8, in_features=32, hidden=64, out=32.
    B, N, D, H = 2, 8, 32, 64
    O = D  # out_features defaults to in_features

    key = jax.random.PRNGKey(0)
    kx, kw1, kb1, kw2, kb2 = jax.random.split(key, 5)

    x = jax.random.normal(kx, (B, N, D), dtype=jnp.float32)
    # PyTorch Linear weight is [out, in]; we store transposed [in, out].
    w1 = jax.random.normal(kw1, (D, H), dtype=jnp.float32) / math.sqrt(D)
    b1 = jax.random.normal(kb1, (H,), dtype=jnp.float32) * 0.02
    w2 = jax.random.normal(kw2, (H, O), dtype=jnp.float32) / math.sqrt(H)
    b2 = jax.random.normal(kb2, (O,), dtype=jnp.float32) * 0.02

    y = mlp_forward(x, w1, b1, w2, b2)
    y = jax.block_until_ready(y)

    y_ref = mlp_reference(x, w1, b1, w2, b2)
    assert y.shape == (B, N, O)
    assert jnp.allclose(y, y_ref, atol=2e-2, rtol=2e-2), "mismatch vs reference"

    print("KERNEL_OK")
</pallas_src>

<mosaic_0001>
module attributes {stable_mosaic.version = 11 : i64} {
  func.func @mlp_kernel(%arg0: i32, %arg1: memref<16x128xbf16, #tpu.memory_space<vmem>>, %arg2: memref<128x128xbf16, #tpu.memory_space<vmem>>, %arg3: memref<1x128xf32, #tpu.memory_space<vmem>>, %arg4: memref<128x128xbf16, #tpu.memory_space<vmem>>, %arg5: memref<1x128xf32, #tpu.memory_space<vmem>>, %arg6: memref<16x128xf32, #tpu.memory_space<vmem>>) attributes {dimension_semantics = [#tpu.dimension_semantics<parallel>], iteration_bounds = array<i64: 1>, scalar_prefetch = 0 : i64, scratch_operands = 0 : i64, tpu.core_type = #tpu.core_type<tc>, window_params = [{transform_indices = @transform_0, window_bounds = array<i64: 16, 128>}, {pipeline_mode = #tpu.pipeline_mode<synchronous>, transform_indices = @transform_1, window_bounds = array<i64: 128, 128>}, {pipeline_mode = #tpu.pipeline_mode<synchronous>, transform_indices = @transform_2, window_bounds = array<i64: 1, 128>}, {pipeline_mode = #tpu.pipeline_mode<synchronous>, transform_indices = @transform_3, window_bounds = array<i64: 128, 128>}, {pipeline_mode = #tpu.pipeline_mode<synchronous>, transform_indices = @transform_4, window_bounds = array<i64: 1, 128>}, {transform_indices = @transform_5, window_bounds = array<i64: 16, 128>}]} {
    %c0 = arith.constant 0 : index
    %c0_0 = arith.constant 0 : index
    %0 = vector.load %arg1[%c0, %c0_0] : memref<16x128xbf16, #tpu.memory_space<vmem>>, vector<16x128xbf16>
    %c0_1 = arith.constant 0 : index
    %c0_2 = arith.constant 0 : index
    %1 = vector.load %arg2[%c0_1, %c0_2] : memref<128x128xbf16, #tpu.memory_space<vmem>>, vector<128x128xbf16>
    %cst = arith.constant dense<0.000000e+00> : vector<16x128xf32>
    %2 = tpu.matmul %0, %1, %cst {dimension_numbers = #tpu.dot_dimension_numbers<[1], [0], [0], [1], [0, 0, 1, 1], [], []>} : vector<16x128xbf16>, vector<128x128xbf16>, vector<16x128xf32> -> vector<16x128xf32>
    %c0_3 = arith.constant 0 : index
    %c0_4 = arith.constant 0 : index
    %3 = vector.load %arg3[%c0_3, %c0_4] : memref<1x128xf32, #tpu.memory_space<vmem>>, vector<1x128xf32>
    %4 = vector.broadcast %3 : vector<1x128xf32> to vector<16x128xf32>
    %5 = arith.addf %2, %4 : vector<16x128xf32>
    %cst_5 = arith.constant 5.000000e-01 : f32
    %6 = vector.broadcast %cst_5 : f32 to vector<16x128xf32>
    %7 = arith.mulf %6, %5 : vector<16x128xf32>
    %cst_6 = arith.constant 0.707106769 : f32
    %8 = vector.broadcast %cst_6 : f32 to vector<16x128xf32>
    %9 = arith.mulf %5, %8 : vector<16x128xf32>
    %10 = math.erf %9 : vector<16x128xf32>
    %cst_7 = arith.constant 1.000000e+00 : f32
    %11 = vector.broadcast %cst_7 : f32 to vector<16x128xf32>
    %12 = arith.addf %11, %10 : vector<16x128xf32>
    %13 = arith.mulf %7, %12 : vector<16x128xf32>
    %14 = arith.truncf %13 : vector<16x128xf32> to vector<16x128xbf16>
    %c0_8 = arith.constant 0 : index
    %c0_9 = arith.constant 0 : index
    %15 = vector.load %arg4[%c0_8, %c0_9] : memref<128x128xbf16, #tpu.memory_space<vmem>>, vector<128x128xbf16>
    %cst_10 = arith.constant dense<0.000000e+00> : vector<16x128xf32>
    %16 = tpu.matmul %14, %15, %cst_10 {dimension_numbers = #tpu.dot_dimension_numbers<[1], [0], [0], [1], [0, 0, 1, 1], [], []>} : vector<16x128xbf16>, vector<128x128xbf16>, vector<16x128xf32> -> vector<16x128xf32>
    %c0_11 = arith.constant 0 : index
    %c0_12 = arith.constant 0 : index
    %17 = vector.load %arg5[%c0_11, %c0_12] : memref<1x128xf32, #tpu.memory_space<vmem>>, vector<1x128xf32>
    %18 = vector.broadcast %17 : vector<1x128xf32> to vector<16x128xf32>
    %19 = arith.addf %16, %18 : vector<16x128xf32>
    %c0_13 = arith.constant 0 : index
    %c0_14 = arith.constant 0 : index
    %20 = vector.load %arg6[%c0_13, %c0_14] : memref<16x128xf32, #tpu.memory_space<vmem>>, vector<16x128xf32>
    tpu.vector_store %arg6[%c0_13, %c0_14], %19 {strides = array<i32>} : memref<16x128xf32, #tpu.memory_space<vmem>>, vector<16x128xf32>,
    return
  }
  func.func @transform_0(%arg0: i32) -> (i32, i32) {
    %c0_i32 = arith.constant 0 : i32
    %c0_i32_0 = arith.constant 0 : i32
    return %arg0, %c0_i32 : i32, i32
  }
  func.func @transform_1(%arg0: i32) -> (i32, i32) {
    %c0_i32 = arith.constant 0 : i32
    %c0_i32_0 = arith.constant 0 : i32
    %c0_i32_1 = arith.constant 0 : i32
    return %c0_i32, %c0_i32_0 : i32, i32
  }
  func.func @transform_2(%arg0: i32) -> (i32, i32) {
    %c0_i32 = arith.constant 0 : i32
    %c0_i32_0 = arith.constant 0 : i32
    %c0_i32_1 = arith.constant 0 : i32
    return %c0_i32, %c0_i32_0 : i32, i32
  }
  func.func @transform_3(%arg0: i32) -> (i32, i32) {
    %c0_i32 = arith.constant 0 : i32
    %c0_i32_0 = arith.constant 0 : i32
    %c0_i32_1 = arith.constant 0 : i32
    return %c0_i32, %c0_i32_0 : i32, i32
  }
  func.func @transform_4(%arg0: i32) -> (i32, i32) {
    %c0_i32 = arith.constant 0 : i32
    %c0_i32_0 = arith.constant 0 : i32
    %c0_i32_1 = arith.constant 0 : i32
    return %c0_i32, %c0_i32_0 : i32, i32
  }
  func.func @transform_5(%arg0: i32) -> (i32, i32) {
    %c0_i32 = arith.constant 0 : i32
    %c0_i32_0 = arith.constant 0 : i32
    return %arg0, %c0_i32 : i32, i32
  }
}

</mosaic_0001>

<bundles_post_ra>
// kernel: tpu_custom_call.1
= control target key start
LH: loop header
LB: loop body
LE: loop exit
PB: predicated region body
PF: predicated region fallthrough
CT: control target
= control target key end

     0   :  { %10 = vsyncpa [#allocation3], 0  ;;  %s628_s0 = inlined_call_operand.hbm [shape: bf16[16,128], index: 0, kind: input, shape index: {}]   ;;  %s629_s1 = inlined_call_operand.hbm [shape: bf16[128,128], index: 1, kind: input, shape index: {}]   ;;  %s630_s2 = inlined_call_operand.vmem [shape: f32[1,128], index: 2, kind: input, shape index: {}]   ;;  %s631_s3 = inlined_call_operand.hbm [shape: bf16[128,128], index: 3, kind: input, shape index: {}]   ;;  %s632_s4 = inlined_call_operand.vmem [shape: f32[1,128], index: 4, kind: input, shape index: {}]   ;;  %s633_s5 = inlined_call_operand.hbm [shape: f32[16,128], index: 5, kind: output, shape index: {}]  }
   0x1   :  { %11 = vsyncpa [#allocation6], 0 }
   0x2   :  { %12 = vsyncpa [#allocation4], 0  ;;  %s30_s20 = sshll.u32 %s629_s1, 4  ;;  %s554_s21 = smov [#allocation5]   ;;  %s31_s20 = int_to_ptr.hbm [resolvable:$true] %s30_s20 }
   0x3   :  { %s32_s22 = sshll.u32 %s554_s21, 4  ;;  %s17_s25 = sshll.u32 %s628_s0, 4  ;;  %s33_s22 = int_to_ptr.vmem [resolvable:$true] %s32_s22  ;;  %s18_s25 = int_to_ptr.hbm [resolvable:$true] %s17_s25 }
   0x4   :  { %s555_s26 = smov 64   ;;  %s556_s27 = smov 4  }
   0x5   :  { %38 = dma.hbm_to_vmem [thread:$0]  %s31_s20, 1024, %s33_s22, [#allocation6], %s555_s26, %s555_s26, %s556_s27  }
   0x6   :  { %s557_s28 = smov [#allocation2]   ;;  %s45_s7 = sshll.u32 %s631_s3, 4  ;;  %s46_s7 = int_to_ptr.hbm [resolvable:$true] %s45_s7 }
   0x7   :  { %s19_s29 = sshll.u32 %s557_s28, 4  ;;  %s558_s1 = smov [#allocation7]   ;;  %s20_s29 = int_to_ptr.vmem [resolvable:$true] %s19_s29 }
   0x8   :  { %25 = dma.hbm_to_vmem [thread:$0]  %s18_s25, 128, %s20_s29, [#allocation3], %s555_s26, %s555_s26, %s556_s27  }
   0x9   :  { %s47_s8 = sshll.u32 %s558_s1, 4  ;;  %s48_s8 = int_to_ptr.vmem [resolvable:$true] %s47_s8 }
   0xa   :  { %53 = dma.hbm_to_vmem [thread:$0]  %s46_s7, 1024, %s48_s8, [#allocation6], %s555_s26, %s555_s26, %s556_s27  }
   0xb   :  { %548 = dma.done.wait [#allocation3], 128  }
   0xc   :  { %549 = vsyncadd [#allocation3], 4294967168 }
   0xd   :  { %550 = dma.done.wait [#allocation6], 2048  }
   0xe   :  { %551 = vsyncadd [#allocation6], 4294965248  ;;  %v429_v0 = vld [vmem:[#allocation5 + $0x38] sm:$0xff]  ;;  %v428_v1 = vld [vmem:[#allocation5 + $0x30] sm:$0xff]  ;;  %s559_s10 = smov [#allocation8]   ;;  %s337_s14 = sshll.u32 %s633_s5, 4  ;;  %s338_s14 = int_to_ptr.hbm [resolvable:$true] %s337_s14 }
   0xf   :  { %144 = vmatpush.bf16.msra.mxu0 %v429_v0  ;;  %v427_v2 = vld [vmem:[#allocation5 + $0x28] sm:$0xff]  ;;  %v426_v3 = vld [vmem:[#allocation5 + $0x20] sm:$0xff]  ;;  %v425_v4 = vld [vmem:[#allocation5 + $0x18] sm:$0xff]  ;;  %s335_s11 = sshll.u32 %s559_s10, 4  ;;  %s560_s15 = smov 128   ;;  %s336_s11 = int_to_ptr.vmem [resolvable:$true] %s335_s11 }
  0x10   :  { %v424_v5 = vld [vmem:[#allocation5 + $0x10] sm:$0xff]  ;;  %v423_v6 = vld [vmem:[#allocation5 + $0x8] sm:$0xff]  ;;  %v422_v7 = vld [vmem:[#allocation5] sm:$0xff]  ;;  %s561_s16 = smov 8  }
  0x11   :  { %v421_v8 = vld [vmem:[#allocation2] sm:$0xff]  ;;  %v436_v14 = vld [vmem:[#allocation7 + $0x30] sm:$0xff]  ;;  %v435_v16 = vld [vmem:[#allocation7 + $0x28] sm:$0xff] }
  0x12   :  { %v446_v9 = vld [vmem:[%s630_s2] ss:$0 sm:$0xff]  ;;  %v434_v21 = vld [vmem:[#allocation7 + $0x20] sm:$0xff]  ;;  %v432_v33 = vld [vmem:[#allocation7 + $0x10] sm:$0xff] }
  0x13   :  { %145 = vmatpush.bf16.msra.mxu0 %v428_v1  ;;  %v437_v10 = vld [vmem:[#allocation7 + $0x38] sm:$0xff]  ;;  %v431_v41 = vld [vmem:[#allocation7 + $0x8] sm:$0xff]  ;;  %v430_v48 = vld [vmem:[#allocation7] sm:$0xff] }
  0x14   :  { %315 = vmatpush.bf16.msra.mxu1 %v437_v10  ;;  %v433_v27 = vld [vmem:[#allocation7 + $0x18] sm:$0xff] }
  0x17   :  { %146 = vmatpush.bf16.msra.mxu0 %v427_v2 }
  0x18   :  { %316 = vmatpush.bf16.msra.mxu1 %v436_v14 }
  0x1b   :  { %147 = vmatpush.bf16.msra.mxu0 %v426_v3 }
  0x1c   :  { %317 = vmatpush.bf16.msra.mxu1 %v435_v16 }
  0x1f   :  { %148 = vmatpush.bf16.msra.mxu0 %v425_v4 }
  0x20   :  { %318 = vmatpush.bf16.msra.mxu1 %v434_v21 }
  0x23   :  { %149 = vmatpush.bf16.msra.mxu0 %v424_v5 }
  0x24   :  { %319 = vmatpush.bf16.msra.mxu1 %v433_v27 }
  0x27   :  { %150 = vmatpush.bf16.msra.mxu0 %v423_v6 }
  0x28   :  { %320 = vmatpush.bf16.msra.mxu1 %v432_v33 }
  0x2b   :  { %151 = vmatpush.bf16.msra.mxu0 %v422_v7 }
  0x2c   :  { %321 = vmatpush.bf16.msra.mxu1 %v431_v41 }
  0x2e   :  { %152 = vmatmul.bf16.vlgmr.msra.gmra.mxu0 %v421_v8 }
  0x30   :  { %322 = vmatpush.bf16.msra.mxu1 %v430_v48 }
  0xab   :  { %v153_v11 = vpop.f32.mrf.mxu0 }
  0xac   :  { %v604_v12 = vadd.f32 %v446_v9, %v153_v11 }
  0xae   :  { %v607_v13 = vmul.f32 0.70710677, %v604_v12 }
  0xb0   :  { %v162_v15 = vmul.f32 %v607_v13, %v607_v13 }
  0xb2   :  { %v163_v17 = vmin.f32 %v162_v15, 16.0 }
  0xb3   :  { %v155_v18 = vpop.f32.mrf.mxu0 }
  0xb4   :  { %v164_v19 = vmul.f32 2.1237322e-06, %v163_v17  ;;  %v611_v20 = vadd.f32 %v446_v9, %v155_v18  ;;  %v175_v22 = vmul.f32 3.8918573e-05, %v163_v17 }
  0xb6   :  { %v165_v23 = vadd.f32 0.00028619796, %v164_v19  ;;  %v614_v24 = vmul.f32 0.70710677, %v611_v20  ;;  %v176_v25 = vadd.f32 0.001143296, %v175_v22 }
  0xb8   :  { %v202_v26 = vmul.f32 %v614_v24, %v614_v24  ;;  %v166_v28 = vmul.f32 %v165_v23, %v163_v17  ;;  %v177_v29 = vmul.f32 %v176_v25, %v163_v17 }
  0xba   :  { %v203_v30 = vmin.f32 %v202_v26, 16.0  ;;  %v178_v31 = vadd.f32 0.014752088, %v177_v29  ;;  %v167_v35 = vadd.f32 0.0036580483, %v166_v28 }
  0xbc   :  { %v204_v32 = vmul.f32 2.1237322e-06, %v203_v30  ;;  %v215_v34 = vmul.f32 3.8918573e-05, %v203_v30  ;;  %v179_v36 = vmul.f32 %v178_v31, %v163_v17  ;;  %v168_v43 = vmul.f32 %v167_v35, %v163_v17 }
  0xbd   :  { %v159_v35 = vmul.f32 0.5, %v611_v20 }
  0xbe   :  { %v205_v37 = vadd.f32 0.00028619796, %v204_v32  ;;  %v216_v38 = vadd.f32 0.001143296, %v215_v34  ;;  %v180_v39 = vadd.f32 0.112945676, %v179_v36 }
  0xbf   :  { %v169_v50 = vadd.f32 0.05243302, %v168_v43  ;;  %v158_v34 = vmul.f32 0.5, %v604_v12 }
  0xc0   :  { %v206_v40 = vmul.f32 %v205_v37, %v203_v30  ;;  %v217_v42 = vmul.f32 %v216_v38, %v203_v30  ;;  %v181_v44 = vmul.f32 %v180_v39, %v163_v17 }
  0xc1   :  { %v170_v56 = vmul.f32 %v169_v50, %v163_v17 }
  0xc2   :  { %v207_v45 = vadd.f32 0.0036580483, %v206_v40  ;;  %v218_v46 = vadd.f32 0.014752088, %v217_v42  ;;  %v182_v47 = vadd.f32 0.4994258, %v181_v44 }
  0xc3   :  { %v171_v60 = vadd.f32 0.18741608, %v170_v56 }
  0xc4   :  { %v219_v49 = vmul.f32 %v218_v46, %v203_v30  ;;  %v183_v51 = vmul.f32 %v182_v47, %v163_v17  ;;  %v208_v52 = vmul.f32 %v207_v45, %v203_v30 }
  0xc5   :  { %v172_v1 = vmul.f32 %v171_v60, %v163_v17 }
  0xc6   :  { %v220_v53 = vadd.f32 0.112945676, %v219_v49  ;;  %v184_v54 = vadd.f32 1.0, %v183_v51  ;;  %v209_v57 = vadd.f32 0.05243302, %v208_v52 }
  0xc7   :  { %v173_v7 = vadd.f32 1.1283791, %v172_v1 }
  0xc8   :  { %v221_v55 = vmul.f32 %v220_v53, %v203_v30  ;;  %448 = vrcp.f32 %v184_v54  ;;  %v210_v61 = vmul.f32 %v209_v57, %v203_v30  ;;  %v196_v4 = vand.u32 2147483648, %v184_v54 }
  0xc9   :  { %v194_v6 = vand.u32 2147483647, %v184_v54  ;;  %vm190_vm1 = vweird.f32 %v184_v54  ;;  %v174_v16 = vmul.f32 %v173_v7, %v607_v13 }
  0xca   :  { %v222_v58 = vadd.f32 0.4994258, %v221_v55  ;;  %v211_v2 = vadd.f32 0.18741608, %v210_v61  ;;  %v197_v11 = vor.u32 1.1754944e-38, %v196_v4 }
  0xcb   :  { %vm195_vm3 = vcmp.eq.f32.partialorder %v194_v6, 8.507059e+37 }
  0xcc   :  { %v223_v59 = vmul.f32 %v222_v58, %v203_v30  ;;  %v212_v9 = vmul.f32 %v211_v2, %v203_v30 }
  0xce   :  { %v224_v62 = vadd.f32 1.0, %v223_v59  ;;  %v449_v63 = vpop.eup %448  ;;  %v213_v19 = vadd.f32 1.1283791, %v212_v9 }
  0xcf   :  { %v186_v0 = vmul.f32 %v449_v63, %v184_v54  ;;  %vm191_vm0 = vweird.f32 %v449_v63 }
  0xd0   :  { %450 = vrcp.f32 %v224_v62  ;;  %vm192_vm2 = vmor %vm190_vm1, %vm191_vm0  ;;  %v236_v21 = vand.u32 2147483648, %v224_v62  ;;  %v234_v25 = vand.u32 2147483647, %v224_v62  ;;  %vm230_vm5 = vweird.f32 %v224_v62 }
  0xd1   :  { %v187_v3 = vsub.f32 1.0, %v186_v0  ;;  %v214_v28 = vmul.f32 %v213_v19, %v614_v24  ;;  %v447_v24 = vld [vmem:[%s632_s4] ss:$0 sm:$0xff] }
  0xd2   :  { %v237_v27 = vor.u32 1.1754944e-38, %v236_v21  ;;  %vm235_vm7 = vcmp.eq.f32.partialorder %v234_v25, 8.507059e+37 }
  0xd3   :  { %v188_v5 = vmul.f32 %v449_v63, %v187_v3 }
  0xd5   :  { %v189_v10 = vadd.f32 %v449_v63, %v188_v5 }
  0xd6   :  { %v451_v8 = vpop.eup %450 }
  0xd7   :  { %v226_v14 = vmul.f32 %v451_v8, %v224_v62  ;;  %v193_v15 = vsel %vm192_vm2, %v449_v63, %v189_v10  ;;  %vm231_vm4 = vweird.f32 %v451_v8 }
  0xd8   :  { %v198_v18 = vsel %vm195_vm3, %v197_v11, %v193_v15  ;;  %vm232_vm6 = vmor %vm230_vm5, %vm231_vm4 }
  0xd9   :  { %v227_v17 = vsub.f32 1.0, %v226_v14  ;;  %v199_v22 = vmul.f32 %v198_v18, %v174_v16 }
  0xdb   :  { %v228_v23 = vmul.f32 %v451_v8, %v227_v17  ;;  %v387_v29 = vclamps-f32 %v199_v22, 1.0 }
  0xdd   :  { %v229_v26 = vadd.f32 %v451_v8, %v228_v23  ;;  %v242_v33 = vadd.f32 1.0, %v387_v29 }
  0xdf   :  { %v233_v30 = vsel %vm232_vm6, %v451_v8, %v229_v26  ;;  %v244_v37 = vmul.f32 %v242_v33, %v158_v34 }
  0xe0   :  { %v238_v31 = vsel %vm235_vm7, %v237_v27, %v233_v30 }
  0xe1   :  { %v239_v32 = vmul.f32 %v238_v31, %v214_v28 }
  0xe3   :  { %v388_v13 = vclamps-f32 %v239_v32, 1.0 }
  0xe5   :  { %v243_v36 = vadd.f32 1.0, %v388_v13 }
  0xe7   :  { %v245_v38 = vmul.f32 %v243_v36, %v159_v35 }
  0xe9   :  { %v246_v39 = vpack.c.bf16 %v245_v38, %v244_v37 }
  0xeb   :  { %323 = vmatmul.bf16.vlgmr.msra.gmra.mxu1 %v246_v39 }
 0x168   :  { %v324_v40 = vpop.f32.mrf.mxu1 }
 0x169   :  { %v325_v41 = vadd.f32 %v447_v24, %v324_v40 }
 0x16b   :  { %329 = vst [vmem:[#allocation8] sm:$0xff] %v325_v41 }
 0x170   :  { %v326_v12 = vpop.f32.mrf.mxu1 }
 0x171   :  { %v327_v20 = vadd.f32 %v447_v24, %v326_v12 }
 0x173   :  { %330 = vst [vmem:[#allocation8 + $0x8] sm:$0xff] %v327_v20 }
 0x174   :  { %343 = dma.vmem_to_hbm [thread:$0]  %s336_s11, 256, %s338_s14, [#allocation4], %s560_s15, %s560_s15, %s561_s16  }
 0x175   :  { %552 = dma.done.wait [#allocation4], 256  }
 0x176   :  { %553 = vsyncadd [#allocation4], 4294967040 }
 0x177   :  { %348 = vsyncpa [#allocation3], 1 }
 0x178   :  { %349 = vsyncpa [#allocation6], 1 }
 0x179   :  { %350 = vsyncpa [#allocation4], 1 }

</bundles_post_ra>
